<compile_context>
chip_gen: v6e
topology: v6e:2x2x1
jax: 0.10.0
libtpu: 0.0.40
codegen_flags: <defaults>
</compile_context>

<pallas_src>
import functools
import math

import jax
import jax.numpy as jnp
from jax.experimental import pallas as pl
from jax.experimental.pallas import tpu as pltpu


def _round_up(x, m):
    return ((x + m - 1) // m) * m


def _padded_tile_bytes(shape, itemsize=4):
    s = list(shape)
    s[-1] = _round_up(s[-1], 128)
    if len(s) >= 2:
        s[-2] = _round_up(s[-2], 8)
    return math.prod(s) * itemsize


def _vmem_limit_bytes(io_block_shapes, scratch_shapes):
    # Double-buffered I/O blocks + single-buffered scratch, padded to (8,128)
    # tiles, plus headroom; capped by the *actual* generation's VMEM capacity
    # (~128 MiB on v5e/v6e, 64 MiB on v7x) instead of a hard 64 MiB clamp.
    need = (2 * sum(_padded_tile_bytes(s) for s in io_block_shapes)
            + sum(_padded_tile_bytes(s) for s in scratch_shapes))
    cap = 96 << 20                         # conservative fallback (v5e/v6e class)
    try:
        cap = int(pltpu.get_tpu_info().vmem_capacity_bytes) * 85 // 100
    except Exception:
        pass                               # interpret mode / no TPU info available
    return int(max(min(need + (2 << 20), cap), 8 << 20))


def _conv_stats_kernel(x_ref, *rest, wp, spatial, c, halo, apply_input_affine_relu):
    """One grid step = one image.

    x_ref:      (1, c, spatial)       activation, channels on sublanes / spatial on lanes
    [scale_ref, shift_ref: (c, 1)]    optional BN affine (+ReLU) of the previous conv
    maskj_ref:  (2, spatial)          0/1 column-boundary masks (row 0: dj=-1, row 1: dj=+1)
    w_ref:      (c_out, 9*c)          im2col conv weights
    y_ref:      (1, c_out, spatial)   pre-BN conv output
    stats_ref:  (1, c_out, 2)         per-image BN partials: [:,0]=sum, [:,1]=centered M2
    s_ref:      (c, spatial+2*halo)   zero-haloed staging scratch
    col_ref:    (9*c, spatial)        im2col matrix
    """
    if apply_input_affine_relu:
        (scale_ref, shift_ref, maskj_ref, w_ref,
         y_ref, stats_ref, s_ref, col_ref) = rest
    else:
        (maskj_ref, w_ref, y_ref, stats_ref, s_ref, col_ref) = rest

    x = x_ref[0]                                            # (c, spatial)
    if apply_input_affine_relu:
        # BatchNorm (precomputed per-channel affine) + ReLU of the previous conv.
        x = jnp.maximum(x * scale_ref[...] + shift_ref[...], 0.0)

    # Stage with an explicit zero halo along the lane (spatial) axis.  The halo
    # absorbs the +/-wp row-shift taps at the image top/bottom edges, so only
    # column-boundary taps need masking.  Halo strips are zeroed every step:
    # no reads of stale/uninitialized VMEM ever reach the matmul.
    zero_halo = jnp.zeros((c, halo), x.dtype)
    s_ref[:, pl.ds(0, halo)] = zero_halo
    s_ref[:, pl.ds(halo + spatial, halo)] = zero_halo
    s_ref[:, pl.ds(halo, spatial)] = x

    left_ok = maskj_ref[pl.ds(0, 1), :]     # valid positions for dj = -1 taps
    right_ok = maskj_ref[pl.ds(1, 1), :]    # valid positions for dj = +1 taps

    for t in range(9):                       # static, fully unrolled
        di, dj = t // 3 - 1, t % 3 - 1
        tap = s_ref[:, pl.ds(halo + di * wp + dj, spatial)]  # static lane offset
        if dj == -1:
            tap = tap * left_ok
        elif dj == 1:
            tap = tap * right_ok
        col_ref[pl.ds(t * c, c), :] = tap.astype(col_ref.dtype)

    # Single im2col MXU matmul: (c_out, 9c) @ (9c, spatial), f32 accumulation.
    y = jnp.dot(w_ref[...], col_ref[...], preferred_element_type=jnp.float32)
    y_ref[0] = y.astype(y_ref.dtype)

    # Per-image BN partial statistics (two-phase BN, phase 1).  Centered M2
    # avoids the E[x^2]-E[x]^2 cancellation; partials are merged exactly in
    # the wrapper with the parallel-variance (Chan) formula.
    ssum = jnp.sum(y, axis=1, keepdims=True)                 # (c_out, 1)
    mean = ssum * (1.0 / spatial)
    d = y - mean
    m2 = jnp.sum(d * d, axis=1, keepdims=True)               # (c_out, 1)
    stats_ref[0] = jnp.concatenate([ssum, m2], axis=1)


def _affine_relu_kernel(x_ref, scale_ref, shift_ref, o_ref):
    # Phase-2 of the second BatchNorm: per-channel affine + ReLU.
    o_ref[0] = jnp.maximum(x_ref[0] * scale_ref[...] + shift_ref[...],
                           0.0).astype(o_ref.dtype)


def downsampling_block(x, w1, g1, b1, w2, g2, b2, *, eps=1e-5,
                       compute_dtype=jnp.float32):
    """Forward pass of DownsamplingBlock.

    x: (N, C_in, H, W) float32 (NCHW, as in PyTorch).
    w1: (C_mid, C_in, 3, 3), w2: (C_out, C_mid, 3, 3) bias-free conv weights.
    g*/b*: BatchNorm2d weight/bias.  Training-mode (batch-stat) BN.
    compute_dtype: dtype of the im2col operands fed to the MXU.  float32 keeps
      the self-test tight at tiny channel counts (MXU is idle anyway); use
      bfloat16 for large production C (halves im2col VMEM, MXU-native).
    """
    n, c_in, h, w = x.shape
    assert h % 2 == 0 and w % 2 == 0, "MaxPool2d(2) needs even spatial dims"
    hp, wp = h // 2, w // 2
    spatial = hp * wp
    c_mid, c_out = w1.shape[0], w2.shape[0]
    halo = wp + 1                      # covers every tap shift |di*wp + dj|

    # ---- MaxPool2d(2): XLA reshape+max straight from NCHW ------------------
    # Reads x once and writes the 4x smaller pooled slab already in the
    # kernels' (channels, H*W) lane-dense layout; every reshape here is free
    # (no transposes anywhere in the wrapper).
    # TODO(synk): fuse the pool into the first conv kernel for large c_in.
    xf = x.astype(jnp.float32)
    pooled = xf.reshape(n, c_in, hp, 2, wp, 2).max(axis=(3, 5))
    pooled = pooled.reshape(n, c_in, spatial)

    # Conv weights (C_out, C_in, 3, 3) -> (C_out, 9*C_in); column t*C_in + ci
    # matches the im2col row order (t = (di+1)*3 + (dj+1)).
    def prep_w(wt):
        co, ci = wt.shape[0], wt.shape[1]
        return jnp.transpose(wt.astype(compute_dtype), (0, 2, 3, 1)).reshape(co, 9 * ci)

    w1p, w2p = prep_w(w1), prep_w(w2)

    # Column-boundary validity masks (row boundaries are handled by the halo).
    j = jnp.arange(wp, dtype=jnp.int32)
    maskj = jnp.stack([jnp.tile((j >= 1).astype(jnp.float32), hp),
                       jnp.tile((j <= wp - 2).astype(jnp.float32), hp)])  # (2, spatial)

    def conv_stats_call(inp, wmat, c_i, c_o, scale=None, shift=None):
        apply_act = scale is not None
        kern = functools.partial(
            _conv_stats_kernel, wp=wp, spatial=spatial, c=c_i, halo=halo,
            apply_input_affine_relu=apply_act)

        in_arrays = [inp]
        in_specs = [pl.BlockSpec((1, c_i, spatial), lambda i: (i, 0, 0))]
        if apply_act:
            in_arrays += [scale, shift]
            in_specs += [pl.BlockSpec((c_i, 1), lambda i: (0, 0)),
                         pl.BlockSpec((c_i, 1), lambda i: (0, 0))]
        in_arrays += [maskj, wmat]
        in_specs += [pl.BlockSpec((2, spatial), lambda i: (0, 0)),
                     pl.BlockSpec((c_o, 9 * c_i), lambda i: (0, 0))]

        out_shape = (jax.ShapeDtypeStruct((n, c_o, spatial), jnp.float32),
                     jax.ShapeDtypeStruct((n, c_o, 2), jnp.float32))
        out_specs = (pl.BlockSpec((1, c_o, spatial), lambda i: (i, 0, 0)),
                     pl.BlockSpec((1, c_o, 2), lambda i: (i, 0, 0)))

        scratch = [pltpu.VMEM((c_i, spatial + 2 * halo), jnp.float32),
                   pltpu.VMEM((9 * c_i, spatial), compute_dtype)]
        vmem = _vmem_limit_bytes(
            [(1, c_i, spatial), (c_i, 1), (c_i, 1), (2, spatial),
             (c_o, 9 * c_i), (1, c_o, spatial), (1, c_o, 2)],
            [(c_i, spatial + 2 * halo), (9 * c_i, spatial)])

        return pl.pallas_call(
            kern, out_shape=out_shape, grid=(n,),
            in_specs=in_specs, out_specs=out_specs, scratch_shapes=scratch,
            compiler_params=pltpu.CompilerParams(
                dimension_semantics=("parallel",),   # shards images over v7x's 2 TCs
                vmem_limit_bytes=vmem),
        )(*in_arrays)

    def bn_affine(stats, gamma, beta):
        # Two-phase BN, phase 2: exact merge of per-image partials.
        ssum = stats[:, :, 0]                                  # (n, c)
        m2 = stats[:, :, 1]
        count = n * spatial
        mean = jnp.sum(ssum, axis=0) / count                   # (c,)
        block_mean = ssum / spatial
        m2_tot = (jnp.sum(m2, axis=0)
                  + spatial * jnp.sum((block_mean - mean[None, :]) ** 2, axis=0))
        var = m2_tot / count                                   # biased (train mode)
        scale = gamma.astype(jnp.float32) / jnp.sqrt(var + eps)
        shift = beta.astype(jnp.float32) - mean * scale
        return scale.reshape(-1, 1), shift.reshape(-1, 1)

    def affine_relu_call(inp, scale, shift, c_o):
        vmem = _vmem_limit_bytes(
            [(1, c_o, spatial), (c_o, 1), (c_o, 1), (1, c_o, spatial)], [])
        return pl.pallas_call(
            _affine_relu_kernel,
            out_shape=jax.ShapeDtypeStruct((n, c_o, spatial), jnp.float32),
            grid=(n,),
            in_specs=[pl.BlockSpec((1, c_o, spatial), lambda i: (i, 0, 0)),
                      pl.BlockSpec((c_o, 1), lambda i: (0, 0)),
                      pl.BlockSpec((c_o, 1), lambda i: (0, 0))],
            out_specs=pl.BlockSpec((1, c_o, spatial), lambda i: (i, 0, 0)),
            compiler_params=pltpu.CompilerParams(
                dimension_semantics=("parallel",), vmem_limit_bytes=vmem),
        )(inp, scale, shift)

    # conv1 (+BN1 partials) -> BN1 affine -> [BN1+ReLU+conv2] (+BN2 partials)
    # -> BN2 affine -> [BN2+ReLU]
    y1_pre, stats1 = conv_stats_call(pooled, w1p, c_in, c_mid)
    scale1, shift1 = bn_affine(stats1, g1, b1)
    y2_pre, stats2 = conv_stats_call(y1_pre, w2p, c_mid, c_out,
                                     scale=scale1, shift=shift1)
    scale2, shift2 = bn_affine(stats2, g2, b2)
    out = affine_relu_call(y2_pre, scale2, shift2, c_out)

    return out.reshape(n, c_out, hp, wp)     # NCHW, free reshape (no transpose)


def _reference(x, w1, g1, b1, w2, g2, b2, eps=1e-5):
    """Pure-JAX reference of the PyTorch DownsamplingBlock forward (train-mode BN)."""
    n, c, h, w = x.shape
    xp = x.reshape(n, c, h // 2, 2, w // 2, 2).max(axis=(3, 5))

    def conv_bn_relu(inp, wt, g, b):
        out = jax.lax.conv_general_dilated(
            inp, wt, window_strides=(1, 1), padding=((1, 1), (1, 1)),
            dimension_numbers=("NCHW", "OIHW", "NCHW"),
            precision=jax.lax.Precision.HIGHEST)
        mu = out.mean(axis=(0, 2, 3), keepdims=True)
        var = out.var(axis=(0, 2, 3), keepdims=True)   # biased (train mode)
        y = (out - mu) * jax.lax.rsqrt(var + eps)
        y = y * g.reshape(1, -1, 1, 1) + b.reshape(1, -1, 1, 1)
        return jnp.maximum(y, 0.0)

    return conv_bn_relu(conv_bn_relu(xp, w1, g1, b1), w2, g2, b2)


if __name__ == "__main__":
    key = jax.random.PRNGKey(0)
    kx, k1, k2 = jax.random.split(key, 3)

    N, C_in, H, W = 2, 4, 16, 16
    C_out = 8          # DownsamplingBlock(in_channels=4, out_channels=8)

    x = jax.random.normal(kx, (N, C_in, H, W), jnp.float32)
    # Conv2d(kernel_size=3, padding=1, bias=False) weights; synthetic init.
    w1 = jax.random.normal(k1, (C_out, C_in, 3, 3), jnp.float32) * 0.1
    w2 = jax.random.normal(k2, (C_out, C_out, 3, 3), jnp.float32) * 0.1
    # BatchNorm2d default init: weight = 1, bias = 0.
    g1 = jnp.ones((C_out,), jnp.float32)
    b1 = jnp.zeros((C_out,), jnp.float32)
    g2 = jnp.ones((C_out,), jnp.float32)
    b2 = jnp.zeros((C_out,), jnp.float32)

    out = downsampling_block(x, w1, g1, b1, w2, g2, b2)
    jax.block_until_ready(out)

    assert out.shape == (N, C_out, H // 2, W // 2)
    assert bool(jnp.all(jnp.isfinite(out)))

    ref = _reference(x, w1, g1, b1, w2, g2, b2)
    err = float(jnp.max(jnp.abs(out - ref)))
    # Tightened from 1e-1; 1e-3 leaves room for the MXU's multi-pass bf16
    # emulation of f32 matmuls while still catching any tap/mask/halo/BN bug.
    assert err < 1e-3, f"max abs error vs reference too large: {err}"

    print("KERNEL_OK")
</pallas_src>

<mosaic_0001>
module attributes {stable_mosaic.version = 11 : i64} {
  func.func @_conv_stats_kernel(%arg0: i32, %arg1: memref<1x4x64xf32, #tpu.memory_space<vmem>>, %arg2: memref<2x64xf32, #tpu.memory_space<vmem>>, %arg3: memref<8x36xf32, #tpu.memory_space<vmem>>, %arg4: memref<1x8x64xf32, #tpu.memory_space<vmem>>, %arg5: memref<1x8x2xf32, #tpu.memory_space<vmem>>, %arg6: memref<4x82xf32, #tpu.memory_space<vmem>>, %arg7: memref<36x64xf32, #tpu.memory_space<vmem>>) attributes {dimension_semantics = [#tpu.dimension_semantics<parallel>], iteration_bounds = array<i64: 2>, scalar_prefetch = 0 : i64, scratch_operands = 2 : i64, tpu.core_type = #tpu.core_type<tc>, window_params = [{transform_indices = @transform_0, window_bounds = array<i64: 1, 4, 64>}, {pipeline_mode = #tpu.pipeline_mode<synchronous>, transform_indices = @transform_1, window_bounds = array<i64: 2, 64>}, {pipeline_mode = #tpu.pipeline_mode<synchronous>, transform_indices = @transform_2, window_bounds = array<i64: 8, 36>}, {transform_indices = @transform_3, window_bounds = array<i64: 1, 8, 64>}, {transform_indices = @transform_4, window_bounds = array<i64: 1, 8, 2>}]} {
    %c0 = arith.constant 0 : index
    %c0_0 = arith.constant 0 : index
    %c0_1 = arith.constant 0 : index
    %0 = vector.load %arg1[%c0, %c0_0, %c0_1] : memref<1x4x64xf32, #tpu.memory_space<vmem>>, vector<1x4x64xf32>
    %1 = vector.shape_cast %0 : vector<1x4x64xf32> to vector<4x64xf32>
    %cst = arith.constant 0.000000e+00 : f32
    %2 = vector.broadcast %cst : f32 to vector<4x9xf32>
    %c0_2 = arith.constant 0 : index
    %c0_3 = arith.constant 0 : index
    %3 = vector.load %arg6[%c0_2, %c0_3] : memref<4x82xf32, #tpu.memory_space<vmem>>, vector<4x9xf32>
    tpu.vector_store %arg6[%c0_2, %c0_3], %2 {strides = array<i32>} : memref<4x82xf32, #tpu.memory_space<vmem>>, vector<4x9xf32>,
    %c0_4 = arith.constant 0 : index
    %c73 = arith.constant 73 : index
    %4 = vector.load %arg6[%c0_4, %c73] : memref<4x82xf32, #tpu.memory_space<vmem>>, vector<4x9xf32>
    tpu.vector_store %arg6[%c0_4, %c73], %2 {strides = array<i32>} : memref<4x82xf32, #tpu.memory_space<vmem>>, vector<4x9xf32>,
    %c0_5 = arith.constant 0 : index
    %c9 = arith.constant 9 : index
    %5 = vector.load %arg6[%c0_5, %c9] : memref<4x82xf32, #tpu.memory_space<vmem>>, vector<4x64xf32>
    tpu.vector_store %arg6[%c0_5, %c9], %1 {strides = array<i32>} : memref<4x82xf32, #tpu.memory_space<vmem>>, vector<4x64xf32>,
    %c0_6 = arith.constant 0 : index
    %c0_7 = arith.constant 0 : index
    %6 = vector.load %arg2[%c0_6, %c0_7] : memref<2x64xf32, #tpu.memory_space<vmem>>, vector<1x64xf32>
    %c1 = arith.constant 1 : index
    %c0_8 = arith.constant 0 : index
    %7 = vector.load %arg2[%c1, %c0_8] : memref<2x64xf32, #tpu.memory_space<vmem>>, vector<1x64xf32>
    %c0_9 = arith.constant 0 : index
    %c0_10 = arith.constant 0 : index
    %8 = vector.load %arg6[%c0_9, %c0_10] : memref<4x82xf32, #tpu.memory_space<vmem>>, vector<4x64xf32>
    %9 = vector.broadcast %6 : vector<1x64xf32> to vector<4x64xf32>
    %10 = arith.mulf %8, %9 : vector<4x64xf32>
    %c0_11 = arith.constant 0 : index
    %c0_12 = arith.constant 0 : index
    %11 = vector.load %arg7[%c0_11, %c0_12] : memref<36x64xf32, #tpu.memory_space<vmem>>, vector<4x64xf32>
    tpu.vector_store %arg7[%c0_11, %c0_12], %10 {strides = array<i32>} : memref<36x64xf32, #tpu.memory_space<vmem>>, vector<4x64xf32>,
    %c0_13 = arith.constant 0 : index
    %c1_14 = arith.constant 1 : index
    %12 = vector.load %arg6[%c0_13, %c1_14] : memref<4x82xf32, #tpu.memory_space<vmem>>, vector<4x64xf32>
    %c4 = arith.constant 4 : index
    %c0_15 = arith.constant 0 : index
    %13 = vector.load %arg7[%c4, %c0_15] : memref<36x64xf32, #tpu.memory_space<vmem>>, vector<4x64xf32>
    tpu.vector_store %arg7[%c4, %c0_15], %12 {strides = array<i32>} : memref<36x64xf32, #tpu.memory_space<vmem>>, vector<4x64xf32>,
    %c0_16 = arith.constant 0 : index
    %c2 = arith.constant 2 : index
    %14 = vector.load %arg6[%c0_16, %c2] : memref<4x82xf32, #tpu.memory_space<vmem>>, vector<4x64xf32>
    %15 = vector.broadcast %7 : vector<1x64xf32> to vector<4x64xf32>
    %16 = arith.mulf %14, %15 : vector<4x64xf32>
    %c8 = arith.constant 8 : index
    %c0_17 = arith.constant 0 : index
    %17 = vector.load %arg7[%c8, %c0_17] : memref<36x64xf32, #tpu.memory_space<vmem>>, vector<4x64xf32>
    tpu.vector_store %arg7[%c8, %c0_17], %16 {strides = array<i32>} : memref<36x64xf32, #tpu.memory_space<vmem>>, vector<4x64xf32>,
    %c0_18 = arith.constant 0 : index
    %c8_19 = arith.constant 8 : index
    %18 = vector.load %arg6[%c0_18, %c8_19] : memref<4x82xf32, #tpu.memory_space<vmem>>, vector<4x64xf32>
    %19 = vector.broadcast %6 : vector<1x64xf32> to vector<4x64xf32>
    %20 = arith.mulf %18, %19 : vector<4x64xf32>
    %c12 = arith.constant 12 : index
    %c0_20 = arith.constant 0 : index
    %21 = vector.load %arg7[%c12, %c0_20] : memref<36x64xf32, #tpu.memory_space<vmem>>, vector<4x64xf32>
    tpu.vector_store %arg7[%c12, %c0_20], %20 {strides = array<i32>} : memref<36x64xf32, #tpu.memory_space<vmem>>, vector<4x64xf32>,
    %c0_21 = arith.constant 0 : index
    %c9_22 = arith.constant 9 : index
    %22 = vector.load %arg6[%c0_21, %c9_22] : memref<4x82xf32, #tpu.memory_space<vmem>>, vector<4x64xf32>
    %c16 = arith.constant 16 : index
    %c0_23 = arith.constant 0 : index
    %23 = vector.load %arg7[%c16, %c0_23] : memref<36x64xf32, #tpu.memory_space<vmem>>, vector<4x64xf32>
    tpu.vector_store %arg7[%c16, %c0_23], %22 {strides = array<i32>} : memref<36x64xf32, #tpu.memory_space<vmem>>, vector<4x64xf32>,
    %c0_24 = arith.constant 0 : index
    %c10 = arith.constant 10 : index
    %24 = vector.load %arg6[%c0_24, %c10] : memref<4x82xf32, #tpu.memory_space<vmem>>, vector<4x64xf32>
    %25 = vector.broadcast %7 : vector<1x64xf32> to vector<4x64xf32>
    %26 = arith.mulf %24, %25 : vector<4x64xf32>
    %c20 = arith.constant 20 : index
    %c0_25 = arith.constant 0 : index
    %27 = vector.load %arg7[%c20, %c0_25] : memref<36x64xf32, #tpu.memory_space<vmem>>, vector<4x64xf32>
    tpu.vector_store %arg7[%c20, %c0_25], %26 {strides = array<i32>} : memref<36x64xf32, #tpu.memory_space<vmem>>, vector<4x64xf32>,
    %c0_26 = arith.constant 0 : index
    %c16_27 = arith.constant 16 : index
    %28 = vector.load %arg6[%c0_26, %c16_27] : memref<4x82xf32, #tpu.memory_space<vmem>>, vector<4x64xf32>
    %29 = vector.broadcast %6 : vector<1x64xf32> to vector<4x64xf32>
    %30 = arith.mulf %28, %29 : vector<4x64xf32>
    %c24 = arith.constant 24 : index
    %c0_28 = arith.constant 0 : index
    %31 = vector.load %arg7[%c24, %c0_28] : memref<36x64xf32, #tpu.memory_space<vmem>>, vector<4x64xf32>
    tpu.vector_store %arg7[%c24, %c0_28], %30 {strides = array<i32>} : memref<36x64xf32, #tpu.memory_space<vmem>>, vector<4x64xf32>,
    %c0_29 = arith.constant 0 : index
    %c17 = arith.constant 17 : index
    %32 = vector.load %arg6[%c0_29, %c17] : memref<4x82xf32, #tpu.memory_space<vmem>>, vector<4x64xf32>
    %c28 = arith.constant 28 : index
    %c0_30 = arith.constant 0 : index
    %33 = vector.load %arg7[%c28, %c0_30] : memref<36x64xf32, #tpu.memory_space<vmem>>, vector<4x64xf32>
    tpu.vector_store %arg7[%c28, %c0_30], %32 {strides = array<i32>} : memref<36x64xf32, #tpu.memory_space<vmem>>, vector<4x64xf32>,
    %c0_31 = arith.constant 0 : index
    %c18 = arith.constant 18 : index
    %34 = vector.load %arg6[%c0_31, %c18] : memref<4x82xf32, #tpu.memory_space<vmem>>, vector<4x64xf32>
    %35 = vector.broadcast %7 : vector<1x64xf32> to vector<4x64xf32>
    %36 = arith.mulf %34, %35 : vector<4x64xf32>
    %c32 = arith.constant 32 : index
    %c0_32 = arith.constant 0 : index
    %37 = vector.load %arg7[%c32, %c0_32] : memref<36x64xf32, #tpu.memory_space<vmem>>, vector<4x64xf32>
    tpu.vector_store %arg7[%c32, %c0_32], %36 {strides = array<i32>} : memref<36x64xf32, #tpu.memory_space<vmem>>, vector<4x64xf32>,
    %c0_33 = arith.constant 0 : index
    %c0_34 = arith.constant 0 : index
    %38 = vector.load %arg3[%c0_33, %c0_34] : memref<8x36xf32, #tpu.memory_space<vmem>>, vector<8x36xf32>
    %c0_35 = arith.constant 0 : index
    %c0_36 = arith.constant 0 : index
    %39 = vector.load %arg7[%c0_35, %c0_36] : memref<36x64xf32, #tpu.memory_space<vmem>>, vector<36x64xf32>
    %cst_37 = arith.constant dense<0.000000e+00> : vector<8x64xf32>
    %40 = tpu.matmul %38, %39, %cst_37 {dimension_numbers = #tpu.dot_dimension_numbers<[1], [0], [0], [1], [0, 0, 1, 1], [], []>} : vector<8x36xf32>, vector<36x64xf32>, vector<8x64xf32> -> vector<8x64xf32>
    %c0_38 = arith.constant 0 : index
    %c0_39 = arith.constant 0 : index
    %c0_40 = arith.constant 0 : index
    %41 = vector.load %arg4[%c0_38, %c0_39, %c0_40] : memref<1x8x64xf32, #tpu.memory_space<vmem>>, vector<1x8x64xf32>
    %42 = vector.shape_cast %41 : vector<1x8x64xf32> to vector<8x64xf32>
    %43 = vector.shape_cast %40 : vector<8x64xf32> to vector<1x8x64xf32>
    tpu.vector_store %arg4[%c0_38, %c0_39, %c0_40], %43 {strides = array<i32>} : memref<1x8x64xf32, #tpu.memory_space<vmem>>, vector<1x8x64xf32>,
    %cst_41 = arith.constant dense<0.000000e+00> : vector<8xf32>
    %44 = vector.multi_reduction <add>, %40, %cst_41 [1] : vector<8x64xf32> to vector<8xf32>
    %45 = vector.shape_cast %44 : vector<8xf32> to vector<8x1xf32>
    %cst_42 = arith.constant 1.562500e-02 : f32
    %46 = vector.broadcast %cst_42 : f32 to vector<8x1xf32>
    %47 = arith.mulf %45, %46 : vector<8x1xf32>
    %48 = vector.broadcast %47 : vector<8x1xf32> to vector<8x64xf32>
    %49 = arith.subf %40, %48 : vector<8x64xf32>
    %50 = arith.mulf %49, %49 : vector<8x64xf32>
    %cst_43 = arith.constant dense<0.000000e+00> : vector<8xf32>
    %51 = vector.multi_reduction <add>, %50, %cst_43 [1] : vector<8x64xf32> to vector<8xf32>
    %52 = vector.shape_cast %51 : vector<8xf32> to vector<8x1xf32>
    %53 = tpu.concatenate %45, %52 in 1 : vector<8x1xf32>, vector<8x1xf32> -> vector<8x2xf32>
    %c0_44 = arith.constant 0 : index
    %c0_45 = arith.constant 0 : index
    %c0_46 = arith.constant 0 : index
    %54 = vector.load %arg5[%c0_44, %c0_45, %c0_46] : memref<1x8x2xf32, #tpu.memory_space<vmem>>, vector<1x8x2xf32>
    %55 = vector.shape_cast %54 : vector<1x8x2xf32> to vector<8x2xf32>
    %56 = vector.shape_cast %53 : vector<8x2xf32> to vector<1x8x2xf32>
    tpu.vector_store %arg5[%c0_44, %c0_45, %c0_46], %56 {strides = array<i32>} : memref<1x8x2xf32, #tpu.memory_space<vmem>>, vector<1x8x2xf32>,
    return
  }
  func.func @transform_0(%arg0: i32) -> (i32, i32, i32) {
    %c0_i32 = arith.constant 0 : i32
    %c0_i32_0 = arith.constant 0 : i32
    %c0_i32_1 = arith.constant 0 : i32
    return %arg0, %c0_i32, %c0_i32_0 : i32, i32, i32
  }
  func.func @transform_1(%arg0: i32) -> (i32, i32) {
    %c0_i32 = arith.constant 0 : i32
    %c0_i32_0 = arith.constant 0 : i32
    %c0_i32_1 = arith.constant 0 : i32
    return %c0_i32, %c0_i32_0 : i32, i32
  }
  func.func @transform_2(%arg0: i32) -> (i32, i32) {
    %c0_i32 = arith.constant 0 : i32
    %c0_i32_0 = arith.constant 0 : i32
    %c0_i32_1 = arith.constant 0 : i32
    return %c0_i32, %c0_i32_0 : i32, i32
  }
  func.func @transform_3(%arg0: i32) -> (i32, i32, i32) {
    %c0_i32 = arith.constant 0 : i32
    %c0_i32_0 = arith.constant 0 : i32
    %c0_i32_1 = arith.constant 0 : i32
    return %arg0, %c0_i32, %c0_i32_0 : i32, i32, i32
  }
  func.func @transform_4(%arg0: i32) -> (i32, i32, i32) {
    %c0_i32 = arith.constant 0 : i32
    %c0_i32_0 = arith.constant 0 : i32
    %c0_i32_1 = arith.constant 0 : i32
    return %arg0, %c0_i32, %c0_i32_0 : i32, i32, i32
  }
}

</mosaic_0001>

<bundles_post_ra>
// kernel: tpu_custom_call.1
= control target key start
LH: loop header
LB: loop body
LE: loop exit
PB: predicated region body
PF: predicated region fallthrough
CT: control target
= control target key end

     0   :  { %10 = vsyncpa [#allocation5], 0  ;;  %s1083_s0 = inlined_call_operand.hbm [shape: f32[2,4,64], index: 0, kind: input, shape index: {}]   ;;  %s1084_s1 = inlined_call_operand.hbm [shape: f32[2,64], index: 1, kind: input, shape index: {}]   ;;  %s1085_s2 = inlined_call_operand.hbm [shape: f32[8,36], index: 2, kind: input, shape index: {}]   ;;  %s1086_s3 = inlined_call_operand.hbm [shape: f32[2,8,64], index: 3, kind: output, shape index: {0}]   ;;  %s1087_s4 = inlined_call_operand.vmem [shape: f32[2,8,2], index: 4, kind: output, shape index: {1}]  }
   0x1   :  { %12 = vsyncpa [#allocation5 + $0x1], 0 }
   0x2   :  { %13 = vsyncpa [#allocation8], 0 }
   0x3   :  { %14 = vsyncpa [#allocation6], 0 }
   0x4   :  { %16 = vsyncpa [#allocation6 + $0x1], 0  ;;  %s895_s15 = smov 0   ;;  %s897_s16 = smov 0  }
   0x5   :  { %s899_s17 = smov 0   ;;  %s901_s18 = smov 0  }
   0x6 LB: > { %s916_s19 = sadd.s32 4294967295, %s848_s18   ;;  %s577_s20 = sadd.s32 4294967294, %s848_s18   ;;  %s848_s18 = sphi %s901_s18, %s1109_s18   ;;  %s844_s17 = sphi %s899_s17, %s1108_s17   ;;  %s840_s16 = sphi %s897_s16, %s1107_s16   ;;  %s836_s15 = sphi %s895_s15, %s1106_s15  }
   0x7   : > { %p42_p0 = scmp.ne.s32.totalorder %s840_s16, %s836_s15  ;;  %p1088_p1 = scmp.eq.s32.totalorder %s916_s19, 0 }
   0x8   : > { %p114_p3 = scmp.eq.s32.totalorder %s577_s20, 1  ;;  %p578_p5 = scmp.ge.s32.totalorder %s848_s18, 1 }
   0x9   : > { %p925_p4 = por %p1088_p1, %p42_p0  ;;  %p147_p7 = scmp.lt.s32.totalorder %s848_s18, 3 }
   0xa   : > { %p930_p6 = por %p114_p3, %p42_p0  ;;  %s850_s24 = smov [#allocation7]  }
   0xb   : > { %s1092_s21 = scalar_select %p925_p4, 1, 0 }
   0xc   : > { %s1093_s22 = scalar_select %p930_p6, 1, 0 }
   0xd   : > { %p935_p8 = pnand %p578_p5, %p147_p7  ;;  %s160_s25 = sshll.u32 %s850_s24, 4  ;;  %s161_s25 = int_to_ptr.vmem [resolvable:$true] %s160_s25 }
   0xe   : > { %s851_s26 = smov [#allocation9]   ;;  %s949_s29 = sadd.s32 1, %s848_s18  }
   0xf   : > { %s1094_s23 = scalar_select %p935_p8, 1, 0 }
  0x10   : > { %p629_p10 = pneg %p935_p8  ;;  %s171_s27 = sshll.u32 %s851_s26, 4  ;;  %s172_s27 = int_to_ptr.vmem [resolvable:$true] %s171_s27 }
  0x11   : > { %s26_s30 = ssub.s32 %s848_s18, %s949_s29  ;;  %s711_s5 = scalar_lea.vmem %s161_s25, 32 }
  0x12   : > { %p944_p11 = pnand %p629_p10, %p1088_p1  ;;  %p712_p13 = scmp.ne.s32.totalorder %s161_s25, %s711_s5 }
  0x13   : > { %p719_p5 = scmp.lt.s32.totalorder %s161_s25, %s161_s25  ;;  %p720_p7 = scmp.lt.s32.totalorder %s711_s5, %s711_s5 }
  0x14   : > { %p702_p12 = pneg %p944_p11 }
  0x15   : > { %p721_p10 = por %p720_p7, %p719_p5 }
  0x16   : > { %p714_p0 = pnand %p712_p13, %p702_p12 }
  0x18   : > { %p715_p3 = pneg %p714_p0 }
  0x1a   : > { %p722_p9 = pnand %p721_p10, %p715_p3 }
  0x1c   : > { %725 = shalt.err (!%p722_p9)
}
  0x1d   : > { %632 = dma.hbm_to_vmem [thread:$0]  (!%p944_p11), %s1084_s1, 32, %s161_s25, [#allocation8]  }
  0x1e   : > { %s737_s8 = scalar_lea.vmem %s172_s27, 128  ;;  %p745_p13 = scmp.lt.s32.totalorder %s172_s27, %s172_s27 }
  0x1f   : > { %p738_p1 = scmp.ne.s32.totalorder %s172_s27, %s737_s8  ;;  %p746_p0 = scmp.lt.s32.totalorder %s737_s8, %s737_s8 }
  0x21   : > { %p740_p2 = pnand %p738_p1, %p702_p12  ;;  %p747_p4 = por %p746_p0, %p745_p13 }
  0x23   : > { %p741_p6 = pneg %p740_p2 }
  0x25   : > { %p748_p8 = pnand %p747_p4, %p741_p6 }
  0x27   : > { %751 = shalt.err (!%p748_p8)
}
  0x28   : > { %635 = dma.hbm_to_vmem [thread:$0]  (!%p944_p11), %s1085_s2, 128, %s172_s27, [#allocation8]  }
  0x29   : > { %p27_p1 = scmp.eq.s32.totalorder %s26_s30, 0  ;;  %s29_s11 = sadd.s32 1, %s844_s17 }
  0x2a   : > { %p36_p2 = scmp.ne.s32.totalorder %s844_s17, %s840_s16  ;;  %p37_p4 = scmp.eq.s32.totalorder %s848_s18, 0 }
  0x2b   : > { %s976_s12 = scalar_select %p27_p1, %s844_s17, %s29_s11  }
  0x2c   : > { %p38_p6 = por %p37_p4, %p36_p2  ;;  %p1096_p8 = scmp.eq.s32.totalorder %s916_s19, 1 }
  0x2d   : > { %p646_p12 = scmp.lt.s32.totalorder %s848_s18, 2  ;;  %s182_s14 = sand.u32 1, %s844_s17  }
  0x2e   : > { %p980_p9 = por %p1096_p8, %p36_p2  ;;  %s582_s20 = sshll.u32 %s182_s14, 2 }
  0x2f   : > { %s583_s24 = sshll.u32 %s848_s18, 6  ;;  %s186_s28 = scalar_lea.vmem [#allocation4], %s582_s20 }
  0x30   : > { %s1097_s13 = scalar_select %p980_p9, 1, 0 }
  0x31   : > { %s990_s27 = scalar_lea.hbm %s1083_s0, %s583_s24  ;;  %s193_s30 = sshll.u32 %s186_s28, 4  ;;  %s194_s30 = int_to_ptr.vmem [resolvable:$true] %s193_s30 }
  0x32   : > { %p992_p11 = pnand %p646_p12, %p38_p6  ;;  %s183_s6 = scalar_lea.sflag [#allocation5], %s182_s14 }
  0x33   : > { %s752_s7 = scalar_lea.hbm %s990_s27, 64  ;;  %s757_s10 = scalar_lea.hbm %s1083_s0, 128 }
  0x34   : > { %p753_p3 = scmp.ne.s32.totalorder %s990_s27, %s752_s7  ;;  %p754_p5 = pneg %p992_p11 }
  0x35   : > { %p758_p13 = scmp.lt.s32.totalorder %s990_s27, %s1083_s0  ;;  %p759_p0 = scmp.lt.s32.totalorder %s757_s10, %s752_s7 }
  0x36   : > { %p755_p7 = pnand %p754_p5, %p753_p3 }
  0x37   : > { %p760_p1 = por %p759_p0, %p758_p13 }
  0x38   : > { %p756_p10 = pneg %p755_p7 }
  0x3a   : > { %p761_p2 = pnand %p760_p1, %p756_p10 }
  0x3c   : > { %764 = shalt.err (!%p761_p2)
}
  0x3d   : > { %s765_s24 = scalar_lea.vmem %s194_s30, 64  ;;  %s852_s14 = smov [#allocation4]  }
  0x3e   : > { %p766_p4 = scmp.ne.s32.totalorder %s194_s30, %s765_s24  ;;  %s770_s25 = sshll.u32 %s852_s14, 4  ;;  %s771_s25 = int_to_ptr.vmem [resolvable:$false] %s770_s25 }
  0x3f   : > { %s772_s26 = scalar_lea.vmem %s771_s25, 128  ;;  %p773_p12 = scmp.lt.s32.totalorder %s194_s30, %s771_s25 }
  0x40   : > { %p768_p6 = pnand %p766_p4, %p754_p5  ;;  %p774_p3 = scmp.lt.s32.totalorder %s772_s26, %s765_s24 }
  0x42   : > { %p769_p8 = pneg %p768_p6  ;;  %p775_p7 = por %p774_p3, %p773_p12 }
  0x44   : > { %p776_p9 = pnand %p775_p7, %p769_p8 }
  0x46   : > { %779 = shalt.err (!%p776_p9)
}
  0x47   : > { %639 = dma.hbm_to_vmem [thread:$0]  (!%p992_p11), %s990_s27, 64, %s194_s30, %s183_s6  }
  0x48   : > { %p1099_p10 = scmp.ne.s32.totalorder %s1094_s23, 0 }
  0x49   : > { %s1013_s28 = sand.u32 (!%p1099_p10), 1, %s840_s16   ;;  %p1100_p5 = scmp.ne.s32.totalorder (!%p1099_p10), %s1092_s21, 0 }
  0x4a   : > { %202 = sbr.rel (%p1099_p10) target bundleno = 828 (0x33c), region = 32  ;;  %s585_s7 = sshll.u32 (!%p1099_p10), %s1013_s28, 2 }
  0x4b   : > { %s205_s8 = scalar_lea.sflag (!%p1099_p10), [#allocation5], %s1013_s28  ;;  %s208_s9 = scalar_lea.vmem (!%p1099_p10), [#allocation4], %s585_s7 }
  0x4f   : > { %823 = dma.done.wait (%p1100_p5), %s205_s8, 64  }
  0x50   : > { %825 = vsyncadd (%p1100_p5), %s205_s8, 4294967232  ;;  %p1101_p9 = scmp.eq.s32.totalorder %s916_s19, 0 }
  0x52   : > { %827 = dma.done.wait (%p1101_p9), [#allocation8], 160   ;;  %p1102_p11 = pmov %p1101_p9 }
  0x53   : > { %vm250_vm0 = vcmask 68608   ;;  %v853_v0 = vmov 0.0   ;;  %vm252_vm1 = vcmask 667208   ;;  %v590_v1 = vld [vmem:[#allocation7] ss:$0 sm:$0xff]  ;;  %s854_s23 = smov 16  }
  0x54   : > { %829 = vsyncadd (%p1102_p11), [#allocation8], 4294967136  ;;  %251 = vst.msk [vmem:[#allocation2] sm:$0xf] %vm250_vm0, %v853_v0  ;;  %604 = vmatprep.subr.mxu0 %v853_v0  ;;  %v249_v2 = vld [vmem:[%s208_s9] sm:$0xf]  ;;  %319 = vrot.lane.b32.xlu1 %v590_v1, %s854_s23 }
  0x55   : > { %253 = vst.msk [vmem:[#allocation2] sm:$0xf] %vm252_vm1, %v853_v0  ;;  %s855_s21 = smov 9   ;;  %v591_v3 = vld [vmem:[#allocation7 + $0x1] ss:$0 sm:$0xff]  ;;  %s856_s27 = smov 10  }
  0x56   : > { %255 = vrot.lane.b32.xlu0 %v249_v2, %s855_s21  ;;  %s857_s30 = smov 18   ;;  %s858_s5 = smov 8   ;;  %vm258_vm2 = vcmask 592968   ;;  %vm268_vm3 = vcmask 519168   ;;  %vm866_vm4 = vmmov 0   ;;  %vm354_vm5 = vcmask 1043456  }
  0x57   : > { %s859_s6 = smov 2   ;;  %s860_s10 = smov 111   ;;  %614 = vmatprep.mubr.msk.f32.mxu0 %vm866_vm4, %v853_v0  ;;  %v344_v37 = vld [vmem:[#allocation9] sm:$0xff]  ;;  %vm350_vm6 = vcmask 293888   ;;  %vm428_vm7 = vcmask 523264  }
  0x58   : > { %309 = vrot.lane.b32.xlu1 %v591_v3, %s856_s27  ;;  %s861_s11 = smov 119   ;;  %s862_s20 = smov 110  }
  0x59   : > { %s863_s24 = smov 112   ;;  %s864_s14 = smov 118  }
  0x5a   : > { %335 = vrot.lane.b32.xlu0 %v591_v3, %s857_s30  ;;  %s865_s25 = smov 126   ;;  %s867_s26 = smov 120  }
  0x5b   : > { %s868_s7 = smov 127   ;;  %s588_s8 = sshll.u32 %s1013_s28, 3 }
  0x5c   : > { %293 = vrot.lane.b32.xlu1 %v590_v1, %s858_s5  ;;  %s238_s9 = scalar_lea.vmem [#allocation10], %s588_s8  ;;  %s595_s23 = sshll.u32 %s916_s19, 7 }
  0x5d   : > { %s461_s21 = sshll.u32 %s238_s9, 4  ;;  %s459_s5 = scalar_lea.hbm %s1086_s3, %s595_s23  ;;  %s462_s21 = int_to_ptr.vmem [resolvable:$true] %s461_s21 }
  0x5e   : > { %282 = vrot.lane.b32.xlu0 %v591_v3, %s859_s6  ;;  %s444_s6 = scalar_lea.sflag [#allocation6], %s1013_s28  ;;  %p1103_p0 = scmp.ne.s32.totalorder %s1097_s13, 0 }
  0xc6   : > { %v320_v5 = vpop.permute.xlu1 %319 }
  0xc8   : > { %v256_v4 = vpop.permute.xlu0 %255 }
  0xc9   : > { %259 = vst.msk [vmem:[#allocation2] sm:$0xf] %vm258_vm2, %v256_v4 }
  0xca   : > { %v310_v13 = vpop.permute.xlu1 %309 }
  0xcc   : > { %v336_v7 = vpop.permute.xlu0 %335 }
  0xce   : > { %v294_v20 = vpop.permute.xlu1 %293 }
  0xd0   : > { %v262_v6 = vld [vmem:[#allocation2] sm:$0xf]  ;;  %v283_v18 = vpop.permute.xlu0 %282 }
  0xd1   : > { %v267_v8 = vmul.f32 %v590_v1, %v262_v6  ;;  %v334_v9 = vld [vmem:[#allocation2] sm:$0xf] }
  0xd2   : > { %v328_v10 = vld [vmem:[#allocation2] sm:$0xf]  ;;  %v338_v14 = vmul.f32 %v336_v7, %v334_v9 }
  0xd3   : > { %330 = vrot.lane.b32.xlu0 %v328_v10, %s860_s10  ;;  %v302_v11 = vld [vmem:[#allocation2] sm:$0xf]  ;;  %269 = vst.msk [vmem:[#allocation3] sm:$0xf] %vm268_vm3, %v267_v8  ;;  %s780_s10 = scalar_lea.vmem %s462_s21, 128 }
  0xd4   : > { %v318_v12 = vld [vmem:[#allocation2] sm:$0xf]  ;;  %304 = vrot.lane.b32.xlu1 %v302_v11, %s861_s11  ;;  %p781_p13 = scmp.ne.s32.totalorder %s462_s21, %s780_s10  ;;  %s869_s11 = smov [#allocation10]  }
  0xd5   : > { %v308_v15 = vld [vmem:[#allocation2] sm:$0xf]  ;;  %v322_v16 = vmul.f32 %v320_v5, %v318_v12 }
  0xd6   : > { %v276_v17 = vld [vmem:[#allocation2] sm:$0xf]  ;;  %v312_v19 = vmul.f32 %v310_v13, %v308_v15  ;;  %p782_p1 = pnand %p781_p13, %p1103_p0 }
  0xd7   : > { %340 = vrot.lane.b32.xlu0 %v338_v14, %s862_s20  ;;  %v291_v21 = vld [vmem:[#allocation2] sm:$0xf]  ;;  %v285_v22 = vmul.f32 %v283_v18, %v276_v17  ;;  %s784_s20 = sshll.u32 %s869_s11, 4  ;;  %s785_s20 = int_to_ptr.vmem [resolvable:$false] %s784_s20 }
  0xd8   : > { %324 = vrot.lane.b32.xlu1 %v322_v16, %s863_s24  ;;  %v296_v23 = vmul.f32 %v294_v20, %v291_v21  ;;  %v270_v24 = vld [vmem:[#allocation2] sm:$0xf]  ;;  %p783_p2 = pneg %p782_p1  ;;  %s786_s24 = scalar_lea.vmem %s785_s20, 256 }
  0xd9   : > { %p787_p4 = scmp.lt.s32.totalorder %s462_s21, %s785_s20  ;;  %p788_p6 = scmp.lt.s32.totalorder %s786_s24, %s780_s10 }
  0xdb   : > { %314 = vrot.lane.b32.xlu0 %v312_v19, %s864_s14  ;;  %p789_p8 = por %p788_p6, %p787_p4 }
  0xdc   : > { %287 = vrot.lane.b32.xlu1 %v285_v22, %s865_s25 }
  0xdd   : > { %p790_p12 = pnand %p789_p8, %p783_p2 }
  0xdf   : > { %298 = vrot.lane.b32.xlu0 %v296_v23, %s867_s26 }
  0xe0   : > { %272 = vrot.lane.b32.xlu1 %v270_v24, %s868_s7 }
 0x145   : > { %v331_v25 = vpop.permute.xlu0 %330 }
 0x146   : > { %v305_v26 = vpop.permute.xlu1 %304  ;;  %333 = vst.msk [vmem:[#allocation3 + $0x1c] sm:$0xf] %vm268_vm3, %v331_v25 }
 0x147   : > { %307 = vst.msk [vmem:[#allocation3 + $0x10] sm:$0xf] %vm268_vm3, %v305_v26 }
 0x149   : > { %v341_v27 = vpop.permute.xlu0 %340 }
 0x14a   : > { %v325_v28 = vpop.permute.xlu1 %324  ;;  %343 = vst.msk [vmem:[#allocation3 + $0x20] sm:$0xf] %vm268_vm3, %v341_v27 }
 0x14b   : > { %327 = vst.msk [vmem:[#allocation3 + $0x18] sm:$0xf] %vm268_vm3, %v325_v28 }
 0x14d   : > { %v315_v29 = vpop.permute.xlu0 %314 }
 0x14e   : > { %v288_v30 = vpop.permute.xlu1 %287  ;;  %317 = vst.msk [vmem:[#allocation3 + $0x14] sm:$0xf] %vm268_vm3, %v315_v29 }
 0x14f   : > { %290 = vst.msk [vmem:[#allocation3 + $0x8] sm:$0xf] %vm268_vm3, %v288_v30 }
 0x151   : > { %v299_v31 = vpop.permute.xlu0 %298  ;;  %v349_v32 = vld [vmem:[#allocation3 + $0x20] sm:$0xf] }
 0x152   : > { %v273_v33 = vpop.permute.xlu1 %272  ;;  %301 = vst.msk [vmem:[#allocation3 + $0xc] sm:$0xf] %vm268_vm3, %v299_v31  ;;  %605 = vmatpush3.msk.msra.mxu0 %vm354_vm5, %v349_v32  ;;  %v348_v34 = vld [vmem:[#allocation3 + $0x18] sm:$0xff] }
 0x153   : > { %275 = vst.msk [vmem:[#allocation3 + $0x4] sm:$0xf] %vm268_vm3, %v273_v33  ;;  %606 = vmatprep.subr.mxu0 %v853_v0 }
 0x154   : > { %607 = vmatpush3.msra.mxu0 %v348_v34 }
 0x155   : > { %608 = vmatprep.subr.mxu0 %v853_v0  ;;  %v347_v35 = vld [vmem:[#allocation3 + $0x10] sm:$0xff] }
 0x156   : > { %609 = vmatpush3.msra.mxu0 %v347_v35 }
 0x157   : > { %610 = vmatprep.subr.mxu0 %v853_v0 }
 0x159   : > { %v346_v36 = vld [vmem:[#allocation3 + $0x8] sm:$0xff] }
 0x15a   : > { %611 = vmatpush3.msra.mxu0 %v346_v36  ;;  %v345_v38 = vld [vmem:[#allocation3] sm:$0xff] }
 0x15b   : > { %612 = vmatprep.subr.mxu0 %v853_v0 }
 0x15c   : > { %613 = vmatpush3.msra.mxu0 %v345_v38 }
 0x15d   : > { %615 = vmatmul.mubr.msk.f32.vlgmr.msra.gmra.mxu0 %vm350_vm6, %v344_v37 }
 0x21d   : > { %v424_v39 = vpop.f32.mrf.mxu0 }
 0x21e   : > { %v430_v40 = vsel %vm428_vm7, %v424_v39, 0.0  ;;  %429 = vst.msk [vmem:[%s238_s9] sm:$0xff] %vm428_vm7, %v424_v39 }
 0x21f   : > { %431 = vadd.xlane.f32.xlu0 %v430_v40  ;;  %v616_v41 = vpop.f32.mrf.mxu0 }
 0x2a8   : > { %v432_v42 = vpop.xlane.xlu0 %431 }
 0x2a9   : > { %v433_v43 = vmul.f32 0.015625, %v432_v42 }
 0x2ab   : > { %v434_v44 = vsub.f32 %v424_v39, %v433_v43 }
 0x2ad   : > { %v435_v45 = vmul.f32 %v434_v44, %v434_v44 }
 0x2af   : > { %v436_v46 = vsel %vm428_vm7, %v435_v45, 0.0 }
 0x2b0   : > { %437 = vadd.xlane.f32.xlu1 %v436_v46 }
 0x2b1   : > { %793 = shalt.err (!%p790_p12)
}
 0x2b2   : > { %s794_s14 = scalar_lea.hbm %s459_s5, 128  ;;  %s798_s26 = scalar_lea.hbm %s1086_s3, 256 }
 0x2b3   : > { %p795_p3 = scmp.ne.s32.totalorder %s459_s5, %s794_s14  ;;  %p799_p5 = scmp.lt.s32.totalorder %s459_s5, %s1086_s3 }
 0x2b4   : > { %p800_p9 = scmp.lt.s32.totalorder %s798_s26, %s794_s14 }
 0x2b5   : > { %p796_p7 = pnand %p795_p3, %p1103_p0 }
 0x2b6   : > { %p801_p11 = por %p800_p9, %p799_p5 }
 0x2b7   : > { %p797_p10 = pneg %p796_p7 }
 0x2b9   : > { %p802_p13 = pnand %p801_p11, %p797_p10 }
 0x2bb   : > { %805 = shalt.err (!%p802_p13)
}
 0x2bc   : > { %627 = dma.vmem_to_hbm [thread:$0]  (%p1103_p0), %s462_s21, 128, %s459_s5, %s444_s6   ;;  %vm439_vm8 = vcmask 7168   ;;  %vm441_vm9 = vcmask 15360  }
 0x2bd   : > { %p245_p1 = scmp.lt.s32.totalorder %s916_s19, 1 }
 0x2bf   : > { %s1111_s19 = smov (!%p245_p1, %s916_s19), 1 }
 0x2c0   : > { %s589_s9 = sshll.u32 %s1111_s19, 3 }
 0x2c1   : > { %s248_s30 = scalar_lea.vmem %s1087_s4, %s589_s9 }
 0x339   : > { %v438_v47 = vpop.xlane.xlu1 %437 }
 0x33a   : > { %v440_v48 = vsel %vm439_vm8, %v432_v42, %v438_v47 }
 0x33b   : > { %442 = vst.msk [vmem:[%s248_s30] sm:$0xff] %vm441_vm9, %v440_v48 }
 0x33c PF: > { %s476_s13 = sand.u32 1, %s836_s15   ;;  %p1104_p2 = scmp.ne.s32.totalorder %s1093_s22, 0 }
 0x33d   : > { %p1105_p4 = scmp.ge.s32.totalorder %s848_s18, 2  ;;  %s477_s21 = scalar_lea.sflag [#allocation6], %s476_s13 }
 0x33f   : > { %p641_p0 = pnand %p1105_p4, %p1104_p2 }
 0x341   : > { %p642_p6 = pneg %p641_p0 }
 0x343   : > { %831 = dma.done.wait (%p642_p6), %s477_s21, 128  }
 0x344   : > { %833 = vsyncadd (%p642_p6), %s477_s21, 4294967168  ;;  %p19_p8 = scmp.ge.s32.totalorder %s949_s29, 4   ;;  %s1106_s15 = smov %s840_s16 }
 0x345   : > { %s1107_s16 = smov %s844_s17  ;;  %s1108_s17 = smov %s976_s12 }
 0x346   : > { %s1109_s18 = smov %s949_s29  ;;  %21 = sbr.rel (!%p19_p8) target bundleno = 6 (0x6), region = 97 }
 0x34b   :  { %489 = vsyncpa [#allocation5], 1 }
 0x34c   :  { %491 = vsyncpa [#allocation5 + $0x1], 1 }
 0x34d   :  { %492 = vsyncpa [#allocation8], 1 }
 0x34e   :  { %493 = vsyncpa [#allocation6], 1 }
 0x34f   :  { %495 = vsyncpa [#allocation6 + $0x1], 1 }

</bundles_post_ra>
